<compile_context>
chip_gen: v7x
topology: tpu7x:2x2x1
jax: 0.10.0
libtpu: 0.0.40
codegen_flags: <defaults>
</compile_context>

<pallas_src>
import jax
import jax.numpy as jnp
from jax.experimental import pallas as pl
from jax.experimental.pallas import tpu as pltpu


def _gconvgru_linear_kernel(x_ref, wx_ref, bx_ref, wlin_ref, blin_ref,
                            out_ref):
    # x: (N, F), wx: (F, 2C), bx: (1, 2C), wlin: (1, C), blin: (1, 1)
    x = x_ref[...]
    c = wlin_ref.shape[1]

    # One fused MXU matmul for both surviving gates (Z and H_tilde).
    pre = (jnp.dot(x, wx_ref[...], preferred_element_type=jnp.float32)
           + bx_ref[...])                                   # (N, 2C)

    z = jax.nn.sigmoid(pre[:, :c])                          # (N, C)
    h_tilde = jnp.tanh(pre[:, c:])                          # (N, C)

    # H == 0  =>  H_new = Z*H + (1-Z)*H_tilde = (1-Z)*H_tilde
    h_new = (1.0 - z) * h_tilde
    h_relu = jnp.maximum(h_new, 0.0)

    # Final Linear(C, 1) as a VPU multiply + lane (XLU) reduction instead of
    # a 1-lane MXU matmul.
    out = (jnp.sum(h_relu * wlin_ref[...], axis=-1, keepdims=True)
           + blin_ref[...])                                  # (N, 1)
    out_ref[...] = out.astype(out_ref.dtype)


def init_params(key, node_features, hidden_channels):
    """Deterministic synthetic parameters (U[-1/sqrt(fan_in), 1/sqrt(fan_in)]),
    shapes matching GConvGRU(node_features, hidden_channels, K=1) + Linear(C,1).
    ChebConv biases (x-conv and h-conv) are folded into a single bias per gate,
    which is exact because they are summed before the nonlinearity."""
    F, C = node_features, hidden_channels
    ks = jax.random.split(key, 16)

    def u(k, shape, fan_in):
        b = 1.0 / jnp.sqrt(jnp.float32(fan_in))
        return jax.random.uniform(k, shape, jnp.float32, -b, b)

    params = {
        # x-side ChebConv (K=1) weights, stored (in, out)
        "W_xz": u(ks[0], (F, C), F), "W_xr": u(ks[1], (F, C), F),
        "W_xh": u(ks[2], (F, C), F),
        # h-side ChebConv (K=1) weights, stored (in, out).
        # Kept for module fidelity / the full reference; unused by the kernel
        # because H == 0 makes every H-side matmul identically zero.
        "W_hz": u(ks[3], (C, C), C), "W_hr": u(ks[4], (C, C), C),
        "W_hh": u(ks[5], (C, C), C),
        # combined biases (b_x + b_h) per gate, as (1, C) rows
        "b_z": u(ks[6], (1, C), F) + u(ks[7], (1, C), C),
        "b_r": u(ks[8], (1, C), F) + u(ks[9], (1, C), C),
        "b_h": u(ks[10], (1, C), F) + u(ks[11], (1, C), C),
        # final Linear(C, 1), stored (in, out)
        "W_lin": u(ks[12], (C, 1), C),
        "b_lin": u(ks[13], (1, 1), C),
    }
    return params


def recurrent_gcn_gru_forward(params, x, edge_index, edge_weight, h, c):
    """Mirrors RecurrentGCN_GRU.forward(x, edge_index, edge_weight, h, c).

    edge_index / edge_weight are accepted for API fidelity but are unused:
    ChebConv with K=1 only applies T_0(L_hat)=I.  `h`, `c` are ignored by the
    PyTorch module (GConvGRU is called with H=None -> zeros)."""
    del edge_index, edge_weight, h, c
    N = x.shape[0]
    C = params["W_hz"].shape[0]

    # Fuse the two surviving x-side gate weights/biases: (F, 2C) and (1, 2C).
    w_x = jnp.concatenate([params["W_xz"], params["W_xh"]], axis=1)
    b_x = jnp.concatenate([params["b_z"], params["b_h"]], axis=1)
    w_lin_row = params["W_lin"].reshape(1, C)  # (1, C) for lane-wise mul

    vmem = pl.BlockSpec(memory_space=pltpu.MemorySpace.VMEM)
    out = pl.pallas_call(
        _gconvgru_linear_kernel,
        out_shape=jax.ShapeDtypeStruct((N, 1), jnp.float32),
        in_specs=[vmem] * 5,
        out_specs=vmem,
    )(x.astype(jnp.float32), w_x, b_x, w_lin_row, params["b_lin"])
    # TODO(synk): if this module is ever rolled over T timesteps / batched
    # graphs, move that loop inside one pallas_call (grid over T, H in VMEM
    # scratch, weights resident) to amortize launch + DMA overhead.
    return (out, None, None)


def _reference_forward(params, x):
    """Pure-JAX reference of the *full* GConvGRU(K=1, H=None) + Linear math
    (including the dead H-side terms), for a correctness check."""
    N = x.shape[0]
    C = params["W_hz"].shape[0]
    h = jnp.zeros((N, C), jnp.float32)
    z = jax.nn.sigmoid(x @ params["W_xz"] + h @ params["W_hz"] + params["b_z"])
    r = jax.nn.sigmoid(x @ params["W_xr"] + h @ params["W_hr"] + params["b_r"])
    ht = jnp.tanh(x @ params["W_xh"] + (h * r) @ params["W_hh"] + params["b_h"])
    hn = z * h + (1.0 - z) * ht
    return jnp.maximum(hn, 0.0) @ params["W_lin"] + params["b_lin"]


if __name__ == "__main__":
    NODE_FEATURES = 8
    HIDDEN = 32
    N_NODES = 64

    key = jax.random.PRNGKey(0)
    k_param, k_x, k_w = jax.random.split(key, 3)

    params = init_params(k_param, NODE_FEATURES, HIDDEN)

    # Inputs consistent with the module's forward signature.
    x = jax.random.normal(k_x, (N_NODES, NODE_FEATURES), jnp.float32)
    # Simple ring graph (unused computationally for K=1, kept for API fidelity).
    src = jnp.arange(N_NODES, dtype=jnp.int32)
    dst = (src + 1) % N_NODES
    edge_index = jnp.stack([jnp.concatenate([src, dst]),
                            jnp.concatenate([dst, src])], axis=0)
    edge_weight = jax.random.uniform(k_w, (2 * N_NODES,), jnp.float32)
    h_in = jnp.zeros((N_NODES, HIDDEN), jnp.float32)
    c_in = jnp.zeros((N_NODES, HIDDEN), jnp.float32)

    out, _, _ = recurrent_gcn_gru_forward(params, x, edge_index, edge_weight,
                                          h_in, c_in)
    out = jax.block_until_ready(out)

    ref = _reference_forward(params, x)
    assert out.shape == (N_NODES, 1)
    assert jnp.allclose(out, ref, atol=1e-5, rtol=1e-5), "mismatch vs reference"

    print("KERNEL_OK")
</pallas_src>

<mosaic_0001>
module attributes {stable_mosaic.version = 11 : i64} {
  func.func @_gconvgru_linear_kernel(%arg0: memref<64x8xf32, #tpu.memory_space<vmem>>, %arg1: memref<8x64xf32, #tpu.memory_space<vmem>>, %arg2: memref<1x64xf32, #tpu.memory_space<vmem>>, %arg3: memref<1x32xf32, #tpu.memory_space<vmem>>, %arg4: memref<1x1xf32, #tpu.memory_space<vmem>>, %arg5: memref<64x1xf32, #tpu.memory_space<vmem>>) attributes {dimension_semantics = [], scalar_prefetch = 0 : i64, scratch_operands = 0 : i64, tpu.core_type = #tpu.core_type<tc>} {
    %c0 = arith.constant 0 : index
    %c0_0 = arith.constant 0 : index
    %0 = vector.load %arg0[%c0, %c0_0] : memref<64x8xf32, #tpu.memory_space<vmem>>, vector<64x8xf32>
    %c0_1 = arith.constant 0 : index
    %c0_2 = arith.constant 0 : index
    %1 = vector.load %arg1[%c0_1, %c0_2] : memref<8x64xf32, #tpu.memory_space<vmem>>, vector<8x64xf32>
    %cst = arith.constant dense<0.000000e+00> : vector<64x64xf32>
    %2 = tpu.matmul %0, %1, %cst {dimension_numbers = #tpu.dot_dimension_numbers<[1], [0], [0], [1], [0, 0, 1, 1], [], []>} : vector<64x8xf32>, vector<8x64xf32>, vector<64x64xf32> -> vector<64x64xf32>
    %c0_3 = arith.constant 0 : index
    %c0_4 = arith.constant 0 : index
    %3 = vector.load %arg2[%c0_3, %c0_4] : memref<1x64xf32, #tpu.memory_space<vmem>>, vector<1x64xf32>
    %4 = vector.broadcast %3 : vector<1x64xf32> to vector<64x64xf32>
    %5 = arith.addf %2, %4 : vector<64x64xf32>
    %6 = vector.extract_strided_slice %5 {offsets = [0, 0], sizes = [64, 32], strides = [1, 1]} : vector<64x64xf32> to vector<64x32xf32>
    %7 = arith.negf %6 : vector<64x32xf32>
    %8 = math.exp %7 : vector<64x32xf32>
    %cst_5 = arith.constant 1.000000e+00 : f32
    %9 = vector.broadcast %cst_5 : f32 to vector<64x32xf32>
    %10 = arith.addf %9, %8 : vector<64x32xf32>
    %11 = arith.divf %9, %10 : vector<64x32xf32>
    %12 = vector.extract_strided_slice %5 {offsets = [0, 32], sizes = [64, 32], strides = [1, 1]} : vector<64x64xf32> to vector<64x32xf32>
    %13 = math.tanh %12 : vector<64x32xf32>
    %cst_6 = arith.constant 1.000000e+00 : f32
    %14 = vector.broadcast %cst_6 : f32 to vector<64x32xf32>
    %15 = arith.subf %14, %11 : vector<64x32xf32>
    %16 = arith.mulf %15, %13 : vector<64x32xf32>
    %cst_7 = arith.constant 0.000000e+00 : f32
    %17 = vector.broadcast %cst_7 : f32 to vector<64x32xf32>
    %18 = arith.maximumf %16, %17 : vector<64x32xf32>
    %c0_8 = arith.constant 0 : index
    %c0_9 = arith.constant 0 : index
    %19 = vector.load %arg3[%c0_8, %c0_9] : memref<1x32xf32, #tpu.memory_space<vmem>>, vector<1x32xf32>
    %20 = vector.broadcast %19 : vector<1x32xf32> to vector<64x32xf32>
    %21 = arith.mulf %18, %20 : vector<64x32xf32>
    %cst_10 = arith.constant dense<0.000000e+00> : vector<64xf32>
    %22 = vector.multi_reduction <add>, %21, %cst_10 [1] : vector<64x32xf32> to vector<64xf32>
    %23 = vector.shape_cast %22 : vector<64xf32> to vector<64x1xf32>
    %c0_11 = arith.constant 0 : index
    %c0_12 = arith.constant 0 : index
    %24 = vector.load %arg4[%c0_11, %c0_12] : memref<1x1xf32, #tpu.memory_space<vmem>>, vector<1x1xf32>
    %25 = vector.broadcast %24 : vector<1x1xf32> to vector<64x1xf32>
    %26 = arith.addf %23, %25 : vector<64x1xf32>
    %c0_13 = arith.constant 0 : index
    %c0_14 = arith.constant 0 : index
    %27 = vector.load %arg5[%c0_13, %c0_14] : memref<64x1xf32, #tpu.memory_space<vmem>>, vector<64x1xf32>
    tpu.vector_store %arg5[%c0_13, %c0_14], %26 {strides = array<i32>} : memref<64x1xf32, #tpu.memory_space<vmem>>, vector<64x1xf32>,
    return
  }
}

</mosaic_0001>

<bundles_post_ra>
// kernel: tpu_custom_call.1
= control target key start
LH: loop header
LB: loop body
LE: loop exit
PB: predicated region body
PF: predicated region fallthrough
CT: control target
= control target key end

     0   :  { %vm38_vm0 = vcmask 64512   ;;  %vm295_vm1 = vcmask 261120   ;;  %vm335_vm2 = vcmask 7168   ;;  %s556_s1 = inlined_call_operand.vmem [shape: f32[8,64], index: 1, kind: input, shape index: {}]   ;;  %s557_s0 = inlined_call_operand.vmem [shape: f32[64,8], index: 0, kind: input, shape index: {}]   ;;  %s558_s2 = inlined_call_operand.vmem [shape: f32[1,64], index: 2, kind: input, shape index: {}]   ;;  %s559_s4 = inlined_call_operand.<no memory space> [shape: f32[1,1], index: 4, kind: input, shape index: {}]   ;;  %s560_s3 = inlined_call_operand.vmem [shape: f32[1,32], index: 3, kind: input, shape index: {}]   ;;  %s561_s5 = inlined_call_operand.vmem [shape: f32[64,1], index: 5, kind: output, shape index: {}]  }
   0x1   :  { %v30_v0 = vld [vmem:[%s556_s1] sm:$0xff]  ;;  %v23_v3 = vld [vmem:[%s557_s0 + $0x8] sm:$0xff]  ;;  %v24_v5 = vld [vmem:[%s557_s0 + $0x10] sm:$0xff]  ;;  %v10_v32 = vstv %s559_s4 }
   0x2   :  { %v22_v1 = vld [vmem:[%s557_s0] sm:$0xff]  ;;  %376 = vmatprep.subr.mxu0 %v30_v0  ;;  %390 = vmatprep.subr.mxu1 %v30_v0  ;;  %v27_v4 = vld [vmem:[%s557_s0 + $0x28] sm:$0xff]  ;;  %v28_v6 = vld [vmem:[%s557_s0 + $0x30] sm:$0xff]  ;;  %11 = vst [vmem:[#allocation2] sm:$0x1] %v10_v32 }
   0x3   :  { %v26_v2 = vld [vmem:[%s557_s0 + $0x20] sm:$0xff]  ;;  %377 = vmatpush3.msra.mxu0 %v30_v0  ;;  %391 = vmatpush3.msra.mxu1 %v30_v0  ;;  %v25_v7 = vld [vmem:[%s557_s0 + $0x18] sm:$0xff] }
   0x4   :  { %378 = vmatprep.mubr.msk.f32.mxu0 %vm38_vm0, %v22_v1  ;;  %384 = vmatprep.mubr.msk.f32.mxu1 %vm38_vm0, %v26_v2  ;;  %v29_v8 = vld [vmem:[%s557_s0 + $0x38] sm:$0xff]  ;;  %v348_v9 = vld [vmem:[%s558_s2] ss:$0 sm:$0xff]  ;;  %s441_s0 = smov 96  }
   0x5   :  { %379 = vmatmul.mubr.msk.f32.vlgmr.msra.gmra.mrb[0].mxu0 %vm38_vm0, %v23_v3  ;;  %385 = vmatmul.mubr.msk.f32.vlgmr.msra.gmra.mrb[0].mxu1 %vm38_vm0, %v27_v4  ;;  %v365_v4 = vld [vmem:[%s560_s3] ss:$0 sm:$0xff] }
   0x6   :  { %381 = vmatprep.mubr.msk.f32.mxu0 %vm38_vm0, %v24_v5  ;;  %387 = vmatprep.mubr.msk.f32.mxu1 %vm38_vm0, %v28_v6 }
   0x9   :  { %382 = vmatmul.mubr.msk.f32.gmra.mrb[2].mxu0 %vm38_vm0, %v25_v7  ;;  %388 = vmatmul.mubr.msk.f32.gmra.mrb[2].mxu1 %vm38_vm0, %v29_v8 }
  0xd8   :  { %v380_v10 = vpop.f32.mrb[0].mxu0  ;;  %v386_v11 = vpop.f32.mrb[0].mxu1 }
  0xd9   :  { %v135_v12 = vadd.f32 %v380_v10, %v348_v9  ;;  %v155_v13 = vadd.f32 %v386_v11, %v348_v9  ;;  %v129_v14 = vpop.f32.mrb[1].mxu0  ;;  %v149_v15 = vpop.f32.mrb[1].mxu1 }
  0xda   :  { %v130_v16 = vadd.f32 %v348_v9, %v129_v14  ;;  %v150_v21 = vadd.f32 %v348_v9, %v149_v15 }
  0xdb   :  { %393 = vtanh.f32 %v135_v12  ;;  %v358_v35 = vmul.f32 -1.442695, %v135_v12  ;;  %v362_v36 = vmul.f32 -1.442695, %v155_v13 }
  0xdc   :  { %395 = vtanh.f32 %v155_v13  ;;  %v383_v17 = vpop.f32.mrb[2].mxu0  ;;  %v389_v18 = vpop.f32.mrb[2].mxu1  ;;  %v357_v37 = vmul.f32 -1.442695, %v130_v16  ;;  %v361_v38 = vmul.f32 -1.442695, %v150_v21 }
  0xdd   :  { %v139_v19 = vpop.f32.mrb[3].mxu0  ;;  %v159_v20 = vpop.f32.mrb[3].mxu1  ;;  %397 = vtanh.f32 %v130_v16  ;;  %v145_v22 = vadd.f32 %v383_v17, %v348_v9  ;;  %v165_v25 = vadd.f32 %v389_v18, %v348_v9 }
  0xde   :  { %v140_v23 = vadd.f32 %v348_v9, %v139_v19  ;;  %399 = vtanh.f32 %v150_v21  ;;  %v160_v27 = vadd.f32 %v348_v9, %v159_v20 }
  0xdf   :  { %401 = vtanh.f32 %v145_v22  ;;  %v360_v39 = vmul.f32 -1.442695, %v145_v22  ;;  %v364_v44 = vmul.f32 -1.442695, %v165_v25 }
  0xe0   :  { %403 = vtanh.f32 %v140_v23  ;;  %v359_v40 = vmul.f32 -1.442695, %v140_v23  ;;  %v363_v43 = vmul.f32 -1.442695, %v160_v27 }
  0xe1   :  { %405 = vtanh.f32 %v165_v25 }
  0xe2   :  { %407 = vtanh.f32 %v160_v27 }
  0xe3   :  { %409 = vpow2.f32 %v358_v35 }
  0xe4   :  { %411 = vpow2.f32 %v362_v36 }
  0xe5   :  { %v394_v24 = vpop.eup %393  ;;  %413 = vpow2.f32 %v357_v37 }
  0xe6   :  { %v396_v26 = vpop.eup %395  ;;  %242 = vrot.lane.b32.xlu0 %v394_v24, %s441_s0  ;;  %415 = vpow2.f32 %v361_v38 }
  0xe7   :  { %250 = vrot.lane.b32.xlu1 %v396_v26, %s441_s0  ;;  %v398_v28 = vpop.eup %397  ;;  %417 = vpow2.f32 %v360_v39 }
  0xe8   :  { %v400_v29 = vpop.eup %399  ;;  %419 = vpow2.f32 %v359_v40 }
  0xe9   :  { %v402_v30 = vpop.eup %401  ;;  %421 = vpow2.f32 %v363_v43 }
  0xea   :  { %240 = vrot.lane.b32.xlu0 %v398_v28, %s441_s0  ;;  %v404_v31 = vpop.eup %403  ;;  %423 = vpow2.f32 %v364_v44 }
  0xeb   :  { %246 = vrot.lane.b32.xlu1 %v402_v30, %s441_s0  ;;  %v406_v33 = vpop.eup %405 }
  0xec   :  { %v408_v34 = vpop.eup %407 }
  0xed   :  { %v410_v41 = vpop.eup %409 }
  0xee   :  { %248 = vrot.lane.b32.xlu0 %v400_v29, %s441_s0  ;;  %v412_v42 = vpop.eup %411  ;;  %v193_v45 = vadd.f32 1.0, %v410_v41 }
  0xef   :  { %244 = vrot.lane.b32.xlu1 %v404_v31, %s441_s0  ;;  %v197_v46 = vadd.f32 1.0, %v412_v42  ;;  %v414_v47 = vpop.eup %413 }
  0xf0   :  { %425 = vrcp.f32 %v193_v45  ;;  %v416_v48 = vpop.eup %415  ;;  %v192_v49 = vadd.f32 1.0, %v414_v47 }
  0xf1   :  { %427 = vrcp.f32 %v197_v46  ;;  %v418_v50 = vpop.eup %417  ;;  %v196_v51 = vadd.f32 1.0, %v416_v48 }
  0xf2   :  { %252 = vrot.lane.b32.xlu0 %v408_v34, %s441_s0  ;;  %v195_v52 = vadd.f32 1.0, %v418_v50  ;;  %429 = vrcp.f32 %v192_v49  ;;  %v420_v53 = vpop.eup %419 }
  0xf3   :  { %254 = vrot.lane.b32.xlu1 %v406_v33, %s441_s0  ;;  %v422_v54 = vpop.eup %421  ;;  %431 = vrcp.f32 %v196_v51  ;;  %v194_v56 = vadd.f32 1.0, %v420_v53 }
  0xf4   :  { %v424_v55 = vpop.eup %423  ;;  %433 = vrcp.f32 %v195_v52  ;;  %v198_v59 = vadd.f32 1.0, %v422_v54  ;;  %v366_v52 = vld [vmem:[#allocation2] ss:$0 sm:$0xff] }
  0xf5   :  { %v199_v60 = vadd.f32 1.0, %v424_v55  ;;  %435 = vrcp.f32 %v194_v56 }
  0xf6   :  { %437 = vrcp.f32 %v198_v59 }
  0xf7   :  { %439 = vrcp.f32 %v199_v60 }
  0xfa   :  { %v426_v57 = vpop.eup %425 }
  0xfb   :  { %v428_v58 = vpop.eup %427  ;;  %v225_v61 = vsub.f32 1.0, %v426_v57 }
  0xfc   :  { %v229_v62 = vsub.f32 1.0, %v428_v58  ;;  %v430_v0 = vpop.eup %429 }
  0xfd   :  { %v432_v6 = vpop.eup %431  ;;  %v224_v8 = vsub.f32 1.0, %v430_v0 }
  0xfe   :  { %v434_v9 = vpop.eup %433  ;;  %v228_v18 = vsub.f32 1.0, %v432_v6 }
  0xff   :  { %v227_v15 = vsub.f32 1.0, %v434_v9  ;;  %v436_v19 = vpop.eup %435 }
 0x100   :  { %v438_v25 = vpop.eup %437  ;;  %v226_v28 = vsub.f32 1.0, %v436_v19 }
 0x101   :  { %v440_v26 = vpop.eup %439  ;;  %v230_v33 = vsub.f32 1.0, %v438_v25 }
 0x102   :  { %v231_v36 = vsub.f32 1.0, %v440_v26 }
 0x158   :  { %v243_v63 = vpop.permute.xlu0 %242 }
 0x159   :  { %v251_v1 = vpop.permute.xlu1 %250  ;;  %v265_v2 = vmul.f32 %v243_v63, %v225_v61 }
 0x15a   :  { %v269_v3 = vmul.f32 %v251_v1, %v229_v62 }
 0x15b   :  { %v273_v5 = vmax.f32 %v265_v2, 0.0 }
 0x15c   :  { %v277_v7 = vmax.f32 %v269_v3, 0.0  ;;  %v241_v10 = vpop.permute.xlu0 %240 }
 0x15d   :  { %v288_v11 = vmul.f32 %v365_v4, %v273_v5  ;;  %v264_v12 = vmul.f32 %v241_v10, %v224_v8  ;;  %v247_v20 = vpop.permute.xlu1 %246 }
 0x15e   :  { %v292_v13 = vmul.f32 %v365_v4, %v277_v7  ;;  %v267_v22 = vmul.f32 %v247_v20, %v227_v15 }
 0x15f   :  { %v299_v14 = vsel %vm295_vm1, %v288_v11, 0.0  ;;  %v272_v16 = vmax.f32 %v264_v12, 0.0 }
 0x160   :  { %300 = vadd.xlane.f32.xlu1 %v299_v14  ;;  %v311_v17 = vsel %vm295_vm1, %v292_v13, 0.0  ;;  %v249_v21 = vpop.permute.xlu0 %248  ;;  %v275_v27 = vmax.f32 %v267_v22, 0.0 }
 0x161   :  { %312 = vadd.xlane.f32.xlu0 %v311_v17  ;;  %v268_v23 = vmul.f32 %v249_v21, %v228_v18  ;;  %v287_v24 = vmul.f32 %v365_v4, %v272_v16  ;;  %v245_v31 = vpop.permute.xlu1 %244 }
 0x162   :  { %v266_v32 = vmul.f32 %v245_v31, %v226_v28  ;;  %v290_v35 = vmul.f32 %v365_v4, %v275_v27 }
 0x163   :  { %v276_v29 = vmax.f32 %v268_v23, 0.0  ;;  %v296_v30 = vsel %vm295_vm1, %v287_v24, 0.0 }
 0x164   :  { %v253_v37 = vpop.permute.xlu0 %252  ;;  %v274_v38 = vmax.f32 %v266_v32, 0.0  ;;  %v305_v41 = vsel %vm295_vm1, %v290_v35, 0.0 }
 0x165   :  { %297 = vadd.xlane.f32.xlu0 %v296_v30  ;;  %v291_v34 = vmul.f32 %v365_v4, %v276_v29  ;;  %v270_v39 = vmul.f32 %v253_v37, %v230_v33  ;;  %v255_v42 = vpop.permute.xlu1 %254 }
 0x166   :  { %v271_v43 = vmul.f32 %v255_v42, %v231_v36  ;;  %v289_v45 = vmul.f32 %v365_v4, %v274_v38 }
 0x167   :  { %v308_v40 = vsel %vm295_vm1, %v291_v34, 0.0  ;;  %v278_v44 = vmax.f32 %v270_v39, 0.0 }
 0x168   :  { %309 = vadd.xlane.f32.xlu1 %v308_v40  ;;  %v279_v46 = vmax.f32 %v271_v43, 0.0  ;;  %v302_v48 = vsel %vm295_vm1, %v289_v45, 0.0 }
 0x169   :  { %306 = vadd.xlane.f32.xlu0 %v305_v41  ;;  %v293_v47 = vmul.f32 %v365_v4, %v278_v44 }
 0x16a   :  { %v294_v50 = vmul.f32 %v365_v4, %v279_v46 }
 0x16b   :  { %v314_v49 = vsel %vm295_vm1, %v293_v47, 0.0 }
 0x16c   :  { %315 = vadd.xlane.f32.xlu1 %v314_v49  ;;  %v317_v51 = vsel %vm295_vm1, %v294_v50, 0.0 }
 0x16d   :  { %303 = vadd.xlane.f32.xlu0 %v302_v48 }
 0x171   :  { %318 = vadd.xlane.f32.xlu0 %v317_v51 }
 0x1ed   :  { %v301_v53 = vpop.xlane.xlu1 %300 }
 0x1ee   :  { %v328_v54 = vadd.f32 %v366_v52, %v301_v53  ;;  %v313_v55 = vpop.xlane.xlu0 %312 }
 0x1ef   :  { %v332_v56 = vadd.f32 %v366_v52, %v313_v55 }
 0x1f0   :  { %337 = vst.msk [vmem:[%s561_s5 + $0x8] sm:$0xff] %vm335_vm2, %v328_v54 }
 0x1f1   :  { %341 = vst.msk [vmem:[%s561_s5 + $0x28] sm:$0xff] %vm335_vm2, %v332_v56 }
 0x1f2   :  { %v298_v57 = vpop.xlane.xlu0 %297 }
 0x1f3   :  { %v327_v58 = vadd.f32 %v366_v52, %v298_v57 }
 0x1f5   :  { %336 = vst.msk [vmem:[%s561_s5] sm:$0xff] %vm335_vm2, %v327_v58  ;;  %v310_v59 = vpop.xlane.xlu1 %309 }
 0x1f6   :  { %v307_v60 = vpop.xlane.xlu0 %306  ;;  %v331_v61 = vadd.f32 %v366_v52, %v310_v59 }
 0x1f7   :  { %v330_v62 = vadd.f32 %v366_v52, %v307_v60 }
 0x1f8   :  { %340 = vst.msk [vmem:[%s561_s5 + $0x20] sm:$0xff] %vm335_vm2, %v331_v61 }
 0x1f9   :  { %339 = vst.msk [vmem:[%s561_s5 + $0x18] sm:$0xff] %vm335_vm2, %v330_v62  ;;  %v316_v1 = vpop.xlane.xlu1 %315 }
 0x1fa   :  { %v304_v63 = vpop.xlane.xlu0 %303  ;;  %v333_v2 = vadd.f32 %v366_v52, %v316_v1 }
 0x1fb   :  { %v329_v0 = vadd.f32 %v366_v52, %v304_v63 }
 0x1fc   :  { %342 = vst.msk [vmem:[%s561_s5 + $0x30] sm:$0xff] %vm335_vm2, %v333_v2 }
 0x1fd   :  { %338 = vst.msk [vmem:[%s561_s5 + $0x10] sm:$0xff] %vm335_vm2, %v329_v0 }
 0x1fe   :  { %v319_v3 = vpop.xlane.xlu0 %318 }
 0x1ff   :  { %v334_v4 = vadd.f32 %v366_v52, %v319_v3 }
 0x201   :  { %343 = vst.msk [vmem:[%s561_s5 + $0x38] sm:$0xff] %vm335_vm2, %v334_v4 }

</bundles_post_ra>
